<compile_context>
chip_gen: v7x
topology: tpu7x:2x2x1
jax: 0.10.0
libtpu: 0.0.40
codegen_flags: <defaults>
</compile_context>

<pallas_src>
import functools

import jax
import jax.numpy as jnp
from jax.experimental import pallas as pl
from jax.experimental.pallas import tpu as pltpu


def _round_up(v, m):
    return ((v + m - 1) // m) * m


# ----------------------------------------------------------------------------
# Pallas kernel: fused matmul + BN affine + optional ReLU
# ----------------------------------------------------------------------------
def _convt_affine_kernel(x_ref, w_ref, s_ref, b_ref, o_ref, *, relu):
    # x:(tm, C1) bf16, w:(C1, N) bf16, s/b:(1, N) f32, o:(tm, N) f32
    acc = jnp.dot(x_ref[...], w_ref[...], preferred_element_type=jnp.float32)
    y = acc * s_ref[...] + b_ref[...]
    if relu:
        y = jnp.maximum(y, 0.0)
    o_ref[...] = y


# ----------------------------------------------------------------------------
# Wrapper: ConvTranspose2d(k=2, s=2, p=0, bias=False) + fused BN(eval) + ReLU
# ----------------------------------------------------------------------------
def conv_transpose_2x2_bn_act(x_nchw, weight, scale_c, bias_c, *, relu=True):
    """x_nchw: (B, C1, H, W) f32.  weight: (C1, C2, 2, 2) (PyTorch ConvTranspose2d layout).
    scale_c/bias_c: fused BN affine per output channel.  Returns NCHW (B, C2, 2H, 2W) f32."""
    B, C1, H, Wsp = x_nchw.shape
    C2 = weight.shape[1]
    Cp = _round_up(C2, 128)          # lane-dense output channels
    N = 4 * Cp                       # (dy, dx, c) packed along N
    M = B * H * Wsp

    # --- entry layout conversion (once): NCHW -> (M, C1), channels on lanes, bf16 for MXU ---
    X = x_nchw.transpose(0, 2, 3, 1).reshape(M, C1).astype(jnp.bfloat16)

    # --- pack weights: (C1, C2, 2, 2) -> (C1, 4*Cp) with column order (dy, dx, c) ---
    w_p = jnp.transpose(weight, (0, 2, 3, 1))                      # (C1, 2, 2, C2)
    w_p = jnp.pad(w_p, ((0, 0), (0, 0), (0, 0), (0, Cp - C2)))
    w_mat = w_p.reshape(C1, N).astype(jnp.bfloat16)

    scale_p = jnp.pad(scale_c.astype(jnp.float32), (0, Cp - C2))
    bias_p = jnp.pad(bias_c.astype(jnp.float32), (0, Cp - C2))
    scale_mat = jnp.tile(scale_p, 4).reshape(1, N)
    bias_mat = jnp.tile(bias_p, 4).reshape(1, N)

    # --- tiling: keep >= 2 grid steps so input DMA overlaps the matmul ---
    tm = min(256, _round_up(M, 8))
    grid = (pl.cdiv(M, tm),)

    # explicit VMEM budget (double-buffered X/out blocks + resident W + scale/bias), with headroom
    vmem_est = 2 * (tm * C1 * 2) + C1 * N * 2 + 2 * (tm * N * 4) + 4 * N * 4
    vmem_limit = int(min(32 * 1024 * 1024, max(4 * 1024 * 1024, 2 * vmem_est)))

    out = pl.pallas_call(
        functools.partial(_convt_affine_kernel, relu=relu),
        out_shape=jax.ShapeDtypeStruct((M, N), jnp.float32),
        grid=grid,
        in_specs=[
            pl.BlockSpec((tm, C1), lambda i: (i, 0)),
            pl.BlockSpec((C1, N), lambda i: (0, 0)),
            pl.BlockSpec((1, N), lambda i: (0, 0)),
            pl.BlockSpec((1, N), lambda i: (0, 0)),
        ],
        out_specs=pl.BlockSpec((tm, N), lambda i: (i, 0)),
        compiler_params=pltpu.CompilerParams(
            dimension_semantics=("parallel",),
            vmem_limit_bytes=vmem_limit,
        ),
    )(X, w_mat, scale_mat, bias_mat)

    # --- exit layout conversion (once): (M, 4*Cp) -> NCHW (B, C2, 2H, 2W) ---
    y = out.reshape(B, H, Wsp, 2, 2, Cp)           # (b, h, w, dy, dx, c)  -- free view
    y = jnp.transpose(y, (0, 5, 1, 3, 2, 4))       # (b, c, h, dy, w, dx)
    y = y.reshape(B, Cp, 2 * H, 2 * Wsp)[:, :C2]
    return y


# ----------------------------------------------------------------------------
# Parameter init (deterministic, synthetic; BN fused in eval mode) + reference
# ----------------------------------------------------------------------------
def init_params(key, c1, c2, eps=1e-5):
    k1, k2, k3, k4, k5 = jax.random.split(key, 5)
    w = jax.random.normal(k1, (c1, c2, 2, 2), jnp.float32) / jnp.sqrt(c1 * 4.0)
    gamma = 1.0 + 0.1 * jax.random.normal(k2, (c2,), jnp.float32)
    beta = 0.1 * jax.random.normal(k3, (c2,), jnp.float32)
    mean = 0.1 * jax.random.normal(k4, (c2,), jnp.float32)
    var = 1.0 + 0.1 * jax.random.uniform(k5, (c2,), jnp.float32)
    scale = gamma / jnp.sqrt(var + eps)
    bias = beta - mean * scale
    return w, scale, bias


def reference(x, w, scale, bias, relu=True):
    """Pure-JAX f32 reference: ConvTranspose2d(k=2,s=2,p=0,bias=False) + BN affine + ReLU."""
    B, _, H, Wsp = x.shape
    C2 = w.shape[1]
    # out[b, o, 2h+dy, 2w+dx] = sum_i x[b, i, h, w] * w[i, o, dy, dx]
    t = jnp.einsum("bihw,ioyx->bohywx", x, w)      # (B, C2, H, 2, W, 2)
    t = t.reshape(B, C2, 2 * H, 2 * Wsp)
    y = t * scale[None, :, None, None] + bias[None, :, None, None]
    return jnp.maximum(y, 0.0) if relu else y


# ----------------------------------------------------------------------------
if __name__ == "__main__":
    key = jax.random.PRNGKey(0)
    B, c1, c2, H, W = 2, 16, 16, 16, 16            # small shapes consistent with the module
    kx, kp = jax.random.split(key)
    x = jax.random.normal(kx, (B, c1, H, W), jnp.float32)
    w, scale, bias = init_params(kp, c1, c2)

    fwd = jax.jit(functools.partial(conv_transpose_2x2_bn_act, relu=True))
    y = fwd(x, w, scale, bias)
    jax.block_until_ready(y)

    assert y.shape == (B, c2, 2 * H, 2 * W), y.shape

    y_ref = reference(x, w, scale, bias, relu=True)
    err = float(jnp.max(jnp.abs(y - y_ref)))
    assert err < 5e-2, f"max abs err {err}"

    print("KERNEL_OK")
</pallas_src>

<mosaic_0001>
module attributes {stable_mosaic.version = 11 : i64} {
  func.func @_convt_affine_kernel(%arg0: i32, %arg1: memref<256x16xbf16, #tpu.memory_space<vmem>>, %arg2: memref<16x512xbf16, #tpu.memory_space<vmem>>, %arg3: memref<1x512xf32, #tpu.memory_space<vmem>>, %arg4: memref<1x512xf32, #tpu.memory_space<vmem>>, %arg5: memref<256x512xf32, #tpu.memory_space<vmem>>) attributes {dimension_semantics = [#tpu.dimension_semantics<parallel>], iteration_bounds = array<i64: 2>, scalar_prefetch = 0 : i64, scratch_operands = 0 : i64, tpu.core_type = #tpu.core_type<tc>, window_params = [{transform_indices = @transform_0, window_bounds = array<i64: 256, 16>}, {pipeline_mode = #tpu.pipeline_mode<synchronous>, transform_indices = @transform_1, window_bounds = array<i64: 16, 512>}, {pipeline_mode = #tpu.pipeline_mode<synchronous>, transform_indices = @transform_2, window_bounds = array<i64: 1, 512>}, {pipeline_mode = #tpu.pipeline_mode<synchronous>, transform_indices = @transform_3, window_bounds = array<i64: 1, 512>}, {transform_indices = @transform_4, window_bounds = array<i64: 256, 512>}]} {
    %c0 = arith.constant 0 : index
    %c0_0 = arith.constant 0 : index
    %0 = vector.load %arg1[%c0, %c0_0] : memref<256x16xbf16, #tpu.memory_space<vmem>>, vector<256x16xbf16>
    %c0_1 = arith.constant 0 : index
    %c0_2 = arith.constant 0 : index
    %1 = vector.load %arg2[%c0_1, %c0_2] : memref<16x512xbf16, #tpu.memory_space<vmem>>, vector<16x512xbf16>
    %cst = arith.constant dense<0.000000e+00> : vector<256x512xf32>
    %2 = tpu.matmul %0, %1, %cst {dimension_numbers = #tpu.dot_dimension_numbers<[1], [0], [0], [1], [0, 0, 1, 1], [], []>} : vector<256x16xbf16>, vector<16x512xbf16>, vector<256x512xf32> -> vector<256x512xf32>
    %c0_3 = arith.constant 0 : index
    %c0_4 = arith.constant 0 : index
    %3 = vector.load %arg3[%c0_3, %c0_4] : memref<1x512xf32, #tpu.memory_space<vmem>>, vector<1x512xf32>
    %4 = vector.broadcast %3 : vector<1x512xf32> to vector<256x512xf32>
    %5 = arith.mulf %2, %4 : vector<256x512xf32>
    %c0_5 = arith.constant 0 : index
    %c0_6 = arith.constant 0 : index
    %6 = vector.load %arg4[%c0_5, %c0_6] : memref<1x512xf32, #tpu.memory_space<vmem>>, vector<1x512xf32>
    %7 = vector.broadcast %6 : vector<1x512xf32> to vector<256x512xf32>
    %8 = arith.addf %5, %7 : vector<256x512xf32>
    %cst_7 = arith.constant 0.000000e+00 : f32
    %9 = vector.broadcast %cst_7 : f32 to vector<256x512xf32>
    %10 = arith.maximumf %8, %9 : vector<256x512xf32>
    %c0_8 = arith.constant 0 : index
    %c0_9 = arith.constant 0 : index
    %11 = vector.load %arg5[%c0_8, %c0_9] : memref<256x512xf32, #tpu.memory_space<vmem>>, vector<256x512xf32>
    tpu.vector_store %arg5[%c0_8, %c0_9], %10 {strides = array<i32>} : memref<256x512xf32, #tpu.memory_space<vmem>>, vector<256x512xf32>,
    return
  }
  func.func @transform_0(%arg0: i32) -> (i32, i32) {
    %c0_i32 = arith.constant 0 : i32
    %c0_i32_0 = arith.constant 0 : i32
    return %arg0, %c0_i32 : i32, i32
  }
  func.func @transform_1(%arg0: i32) -> (i32, i32) {
    %c0_i32 = arith.constant 0 : i32
    %c0_i32_0 = arith.constant 0 : i32
    %c0_i32_1 = arith.constant 0 : i32
    return %c0_i32, %c0_i32_0 : i32, i32
  }
  func.func @transform_2(%arg0: i32) -> (i32, i32) {
    %c0_i32 = arith.constant 0 : i32
    %c0_i32_0 = arith.constant 0 : i32
    %c0_i32_1 = arith.constant 0 : i32
    return %c0_i32, %c0_i32_0 : i32, i32
  }
  func.func @transform_3(%arg0: i32) -> (i32, i32) {
    %c0_i32 = arith.constant 0 : i32
    %c0_i32_0 = arith.constant 0 : i32
    %c0_i32_1 = arith.constant 0 : i32
    return %c0_i32, %c0_i32_0 : i32, i32
  }
  func.func @transform_4(%arg0: i32) -> (i32, i32) {
    %c0_i32 = arith.constant 0 : i32
    %c0_i32_0 = arith.constant 0 : i32
    return %arg0, %c0_i32 : i32, i32
  }
}

</mosaic_0001>

<bundles_post_ra>
// kernel: tile.18
= control target key start
LH: loop header
LB: loop body
LE: loop exit
PB: predicated region body
PF: predicated region fallthrough
CT: control target
= control target key end

     0   :  { %s22_s0 = inlined_call_operand.vmem [shape: f32[128], index: 0, kind: input, shape index: {}]   ;;  %s23_s1 = inlined_call_operand.vmem [shape: f32[4,128], index: 1, kind: output, shape index: {}]  }
   0x1   :  { %v4_v0 = vld [vmem:[%s22_s0] ss:$0 sm:$0xff] }
   0x2   :  { %5 = vst [vmem:[%s23_s1] sm:$0xf] %v4_v0 }

// kernel: conv_transpose_2x2_bn_act.1
= control target key start
LH: loop header
LB: loop body
LE: loop exit
PB: predicated region body
PF: predicated region fallthrough
CT: control target
= control target key end

     0   :  { %s1519_s15 = smov 0   ;;  %s2042_s0 = inlined_call_operand.vmem [shape: bf16[512,16], index: 0, kind: input, shape index: {}]   ;;  %s2043_s1 = inlined_call_operand.vmem [shape: bf16[16,512], index: 1, kind: input, shape index: {}]   ;;  %s2044_s2 = inlined_call_operand.vmem [shape: f32[1,512], index: 2, kind: input, shape index: {}]   ;;  %s2045_s3 = inlined_call_operand.vmem [shape: f32[1,512], index: 3, kind: input, shape index: {}]   ;;  %s2046_s4 = inlined_call_operand.vmem [shape: f32[512,512], index: 4, kind: output, shape index: {}]  }
   0x1 LB: > { %s1389_s16 = sadd.s32 4294967295, %s1491_s15   ;;  %p1393_p0 = scmp.ge.s32.totalorder %s1491_s15, 1  ;;  %s1491_s15 = sphi %s1519_s15, %s14_s15  }
   0x2   : > { %p163_p1 = scmp.lt.s32.totalorder %s1491_s15, 3 }
   0x4   : > { %p164_p2 = pnand %p1393_p0, %p163_p1 }
   0x5   : > { %v1463_v0 = vld [vmem:[%s2043_s1 + $0x4] ss:$16 sps:$4 sm:$0xff] (!%p164_p2)   ;;  %s1394_s19 = sshll.u32 (!%p164_p2), %s1389_s16, 5  ;;  %v1465_v1 = vld [vmem:[%s2043_s1 + $0xc] ss:$16 sps:$4 sm:$0xff] (!%p164_p2)   ;;  %v1493_v2 = vmov (!%p164_p2), 0   ;;  %v777_v21 = vlaneseq (!%p164_p2) }
   0x6   : > { %167 = sbr.rel (%p164_p2) target bundleno = 359 (0x167), region = 36  ;;  %421 = vmatprep.mubr.bf16.mxu0 (!%p164_p2), %v1493_v2  ;;  %614 = vmatprep.mubr.bf16.mxu1 (!%p164_p2), %v1493_v2  ;;  %p191_p3 = scmp.lt.s32.totalorder (!%p164_p2), %s1394_s19, 63  ;;  %v1467_v3 = vld [vmem:[%s2043_s1] ss:$16 sps:$4 sm:$0xff] (!%p164_p2)   ;;  %v1468_v4 = vld [vmem:[%s2043_s1 + $0x8] ss:$16 sps:$4 sm:$0xff] (!%p164_p2)  }
   0x7   : > { %389 = vmatprep.subr.bf16.mxu0 (!%p164_p2), %v1463_v0  ;;  %582 = vmatprep.subr.bf16.mxu1 (!%p164_p2), %v1465_v1  ;;  %vm340_vm0 = vcmask (!%p164_p2), 130048   ;;  %v778_v22 = vshrl.u32 (!%p164_p2), %v777_v21, 7  ;;  %v775_v25 = vld [vmem:[%s2044_s2] sm:$0xf] (!%p164_p2) }
   0x8   : > { %390 = vmatpush1.bf16.msra.mxu0 (!%p164_p2), %v1467_v3  ;;  %583 = vmatpush1.bf16.msra.mxu1 (!%p164_p2), %v1468_v4  ;;  %v925_v28 = vld [vmem:[%s2045_s3] sm:$0xf] (!%p164_p2) }
   0x9   : > { %v779_v23 = vsub.s32 (!%p164_p2), 0, %v778_v22  ;;  %v787_v24 = vsub.s32 (!%p164_p2), 2, %v778_v22  ;;  %v783_v26 = vsub.s32 (!%p164_p2), 1, %v778_v22  ;;  %v791_v27 = vsub.s32 (!%p164_p2), 3, %v778_v22 }
   0xb   : > { %v1633_v29 = vrot.slane (!%p164_p2), %v775_v25, %v779_v23  ;;  %v1635_v30 = vrot.slane (!%p164_p2), %v775_v25, %v787_v24  ;;  %v1637_v31 = vrot.slane (!%p164_p2), %v775_v25, %v783_v26  ;;  %v1639_v32 = vrot.slane (!%p164_p2), %v775_v25, %v791_v27 }
   0xc   : > { %v1641_v33 = vrot.slane (!%p164_p2), %v925_v28, %v779_v23  ;;  %v1643_v34 = vrot.slane (!%p164_p2), %v925_v28, %v787_v24  ;;  %v1645_v37 = vrot.slane (!%p164_p2), %v925_v28, %v783_v26  ;;  %v1647_v38 = vrot.slane (!%p164_p2), %v925_v28, %v791_v27 }
   0xd   : > { %s2048_s19 = smov (!%p191_p3, %s1394_s19), 63 }
   0xe   : > { %s1395_s26 = sshll.u32 %s2048_s19, 2  ;;  %s1453_s8 = sshll.u32 %s2048_s19, 5 }
   0xf   : > { %s1547_s29 = scalar_lea.vmem %s2042_s0, %s1395_s26  ;;  %s1661_s11 = scalar_lea.vmem %s2046_s4, %s1453_s8 }
  0x10   : > { %v1469_v5 = vld [vmem:[%s1547_s29] sm:$0xff]   ;;  %v1470_v6 = vld [vmem:[%s1547_s29 + $0x8] sm:$0xff]   ;;  %v1471_v7 = vld [vmem:[%s1547_s29 + $0x10] sm:$0xff]  }
  0x11   : > { %1419 = vmatmul.mubr.msk.bf16.vlgmr.msra.gmra.mrb[0].mxu0 %vm340_vm0, %v1469_v5  ;;  %1435 = vmatmul.mubr.msk.bf16.vlgmr.msra.gmra.mrb[0].mxu1 %vm340_vm0, %v1469_v5  ;;  %v1472_v8 = vld [vmem:[%s1547_s29 + $0x18] sm:$0xff]   ;;  %v1473_v9 = vld [vmem:[%s1547_s29 + $0x20] sm:$0xff]   ;;  %v1474_v10 = vld [vmem:[%s1547_s29 + $0x28] sm:$0xff]  }
  0x12   : > { %431 = vmatprep.mubr.bf16.mxu0 %v1493_v2  ;;  %624 = vmatprep.mubr.bf16.mxu1 %v1493_v2  ;;  %v1475_v11 = vld [vmem:[%s1547_s29 + $0x30] sm:$0xff]   ;;  %v1476_v12 = vld [vmem:[%s1547_s29 + $0x38] sm:$0xff]   ;;  %v1477_v13 = vld [vmem:[%s1547_s29 + $0x40] sm:$0xff]  }
  0x13   : > { %v1478_v14 = vld [vmem:[%s1547_s29 + $0x48] sm:$0xff]   ;;  %v1479_v15 = vld [vmem:[%s1547_s29 + $0x50] sm:$0xff]   ;;  %v1480_v16 = vld [vmem:[%s1547_s29 + $0x58] sm:$0xff]  }
  0x14   : > { %v1481_v17 = vld [vmem:[%s1547_s29 + $0x60] sm:$0xff]   ;;  %v1482_v18 = vld [vmem:[%s1547_s29 + $0x68] sm:$0xff]   ;;  %v1483_v19 = vld [vmem:[%s1547_s29 + $0x70] sm:$0xff]  }
  0x15   : > { %v1484_v20 = vld [vmem:[%s1547_s29 + $0x78] sm:$0xff]  }
  0x19   : > { %1420 = vmatmul.mubr.msk.bf16.gmra.mrb[4].mxu0 %vm340_vm0, %v1470_v6  ;;  %1436 = vmatmul.mubr.msk.bf16.gmra.mrb[4].mxu1 %vm340_vm0, %v1470_v6 }
  0x1a   : > { %441 = vmatprep.mubr.bf16.mxu0 %v1493_v2  ;;  %634 = vmatprep.mubr.bf16.mxu1 %v1493_v2 }
  0x21   : > { %1421 = vmatmul.mubr.msk.bf16.gmra.mrb[8].mxu0 %vm340_vm0, %v1471_v7  ;;  %1437 = vmatmul.mubr.msk.bf16.gmra.mrb[8].mxu1 %vm340_vm0, %v1471_v7 }
  0x22   : > { %451 = vmatprep.mubr.bf16.mxu0 %v1493_v2  ;;  %644 = vmatprep.mubr.bf16.mxu1 %v1493_v2 }
  0x29   : > { %1422 = vmatmul.mubr.msk.bf16.gmra.mrb[12].mxu0 %vm340_vm0, %v1472_v8  ;;  %1438 = vmatmul.mubr.msk.bf16.gmra.mrb[12].mxu1 %vm340_vm0, %v1472_v8 }
  0x2a   : > { %461 = vmatprep.mubr.bf16.mxu0 %v1493_v2  ;;  %654 = vmatprep.mubr.bf16.mxu1 %v1493_v2 }
  0x31   : > { %1423 = vmatmul.mubr.msk.bf16.gmra.mrb[16].mxu0 %vm340_vm0, %v1473_v9  ;;  %1439 = vmatmul.mubr.msk.bf16.gmra.mrb[16].mxu1 %vm340_vm0, %v1473_v9 }
  0x32   : > { %471 = vmatprep.mubr.bf16.mxu0 %v1493_v2  ;;  %664 = vmatprep.mubr.bf16.mxu1 %v1493_v2 }
  0x39   : > { %1424 = vmatmul.mubr.msk.bf16.gmra.mrb[20].mxu0 %vm340_vm0, %v1474_v10  ;;  %1440 = vmatmul.mubr.msk.bf16.gmra.mrb[20].mxu1 %vm340_vm0, %v1474_v10 }
  0x3a   : > { %481 = vmatprep.mubr.bf16.mxu0 %v1493_v2  ;;  %674 = vmatprep.mubr.bf16.mxu1 %v1493_v2 }
  0x41   : > { %1425 = vmatmul.mubr.msk.bf16.gmra.mrb[24].mxu0 %vm340_vm0, %v1475_v11  ;;  %1441 = vmatmul.mubr.msk.bf16.gmra.mrb[24].mxu1 %vm340_vm0, %v1475_v11 }
  0x42   : > { %491 = vmatprep.mubr.bf16.mxu0 %v1493_v2  ;;  %684 = vmatprep.mubr.bf16.mxu1 %v1493_v2 }
  0x49   : > { %1426 = vmatmul.mubr.msk.bf16.gmra.mrb[28].mxu0 %vm340_vm0, %v1476_v12  ;;  %1442 = vmatmul.mubr.msk.bf16.gmra.mrb[28].mxu1 %vm340_vm0, %v1476_v12 }
  0x4a   : > { %501 = vmatprep.mubr.bf16.mxu0 %v1493_v2  ;;  %694 = vmatprep.mubr.bf16.mxu1 %v1493_v2 }
  0x51   : > { %1427 = vmatmul.mubr.msk.bf16.gmra.mrb[32].mxu0 %vm340_vm0, %v1477_v13  ;;  %1443 = vmatmul.mubr.msk.bf16.gmra.mrb[32].mxu1 %vm340_vm0, %v1477_v13 }
  0x52   : > { %511 = vmatprep.mubr.bf16.mxu0 %v1493_v2  ;;  %704 = vmatprep.mubr.bf16.mxu1 %v1493_v2 }
  0x59   : > { %1428 = vmatmul.mubr.msk.bf16.gmra.mrb[36].mxu0 %vm340_vm0, %v1478_v14  ;;  %1444 = vmatmul.mubr.msk.bf16.gmra.mrb[36].mxu1 %vm340_vm0, %v1478_v14 }
  0x5a   : > { %521 = vmatprep.mubr.bf16.mxu0 %v1493_v2  ;;  %714 = vmatprep.mubr.bf16.mxu1 %v1493_v2 }
  0x61   : > { %1429 = vmatmul.mubr.msk.bf16.gmra.mrb[40].mxu0 %vm340_vm0, %v1479_v15  ;;  %1445 = vmatmul.mubr.msk.bf16.gmra.mrb[40].mxu1 %vm340_vm0, %v1479_v15 }
  0x62   : > { %531 = vmatprep.mubr.bf16.mxu0 %v1493_v2  ;;  %724 = vmatprep.mubr.bf16.mxu1 %v1493_v2 }
  0x69   : > { %1430 = vmatmul.mubr.msk.bf16.gmra.mrb[44].mxu0 %vm340_vm0, %v1480_v16  ;;  %1446 = vmatmul.mubr.msk.bf16.gmra.mrb[44].mxu1 %vm340_vm0, %v1480_v16 }
  0x6a   : > { %541 = vmatprep.mubr.bf16.mxu0 %v1493_v2  ;;  %734 = vmatprep.mubr.bf16.mxu1 %v1493_v2 }
  0x71   : > { %1431 = vmatmul.mubr.msk.bf16.gmra.mrb[48].mxu0 %vm340_vm0, %v1481_v17  ;;  %1447 = vmatmul.mubr.msk.bf16.gmra.mrb[48].mxu1 %vm340_vm0, %v1481_v17 }
  0x72   : > { %551 = vmatprep.mubr.bf16.mxu0 %v1493_v2  ;;  %744 = vmatprep.mubr.bf16.mxu1 %v1493_v2 }
  0x79   : > { %1432 = vmatmul.mubr.msk.bf16.gmra.mrb[52].mxu0 %vm340_vm0, %v1482_v18  ;;  %1448 = vmatmul.mubr.msk.bf16.gmra.mrb[52].mxu1 %vm340_vm0, %v1482_v18 }
  0x7a   : > { %561 = vmatprep.mubr.bf16.mxu0 %v1493_v2  ;;  %754 = vmatprep.mubr.bf16.mxu1 %v1493_v2 }
  0x81   : > { %1433 = vmatmul.mubr.msk.bf16.gmra.mrb[56].mxu0 %vm340_vm0, %v1483_v19  ;;  %1449 = vmatmul.mubr.msk.bf16.gmra.mrb[56].mxu1 %vm340_vm0, %v1483_v19 }
  0x82   : > { %571 = vmatprep.mubr.bf16.mxu0 %v1493_v2  ;;  %764 = vmatprep.mubr.bf16.mxu1 %v1493_v2 }
  0x89   : > { %1434 = vmatmul.mubr.msk.bf16.gmra.mrb[60].mxu0 %vm340_vm0, %v1484_v20  ;;  %1450 = vmatmul.mubr.msk.bf16.gmra.mrb[60].mxu1 %vm340_vm0, %v1484_v20 }
  0xe4   : > { %v423_v35 = vpop.f32.mrb[0].mxu0  ;;  %v616_v36 = vpop.f32.mrb[0].mxu1 }
  0xe5   : > { %v797_v39 = vmul.f32 %v1633_v29, %v423_v35  ;;  %v799_v40 = vmul.f32 %v1635_v30, %v616_v36  ;;  %v425_v41 = vpop.f32.mrb[1].mxu0  ;;  %v618_v42 = vpop.f32.mrb[1].mxu1 }
  0xe6   : > { %v798_v43 = vmul.f32 %v1637_v31, %v425_v41  ;;  %v800_v44 = vmul.f32 %v1639_v32, %v618_v42  ;;  %v427_v45 = vpop.f32.mrb[2].mxu0  ;;  %v620_v46 = vpop.f32.mrb[2].mxu1 }
  0xe7   : > { %v947_v47 = vadd.f32 %v1641_v33, %v797_v39  ;;  %v949_v48 = vadd.f32 %v1643_v34, %v799_v40  ;;  %v801_v49 = vmul.f32 %v1633_v29, %v427_v45  ;;  %v803_v50 = vmul.f32 %v1635_v30, %v620_v46  ;;  %v429_v51 = vpop.f32.mrb[3].mxu0  ;;  %v622_v52 = vpop.f32.mrb[3].mxu1 }
  0xe8   : > { %v948_v53 = vadd.f32 %v1645_v37, %v798_v43  ;;  %v950_v54 = vadd.f32 %v1647_v38, %v800_v44  ;;  %v802_v55 = vmul.f32 %v1637_v31, %v429_v51  ;;  %v804_v56 = vmul.f32 %v1639_v32, %v622_v52 }
  0xe9   : > { %v1075_v57 = vmax.f32 %v947_v47, 0.0  ;;  %v1077_v58 = vmax.f32 %v949_v48, 0.0  ;;  %v951_v59 = vadd.f32 %v1641_v33, %v801_v49  ;;  %v953_v60 = vadd.f32 %v1643_v34, %v803_v50 }
  0xea   : > { %v1076_v61 = vmax.f32 %v948_v53, 0.0  ;;  %v1078_v62 = vmax.f32 %v950_v54, 0.0  ;;  %v952_v63 = vadd.f32 %v1645_v37, %v802_v55  ;;  %v954_v0 = vadd.f32 %v1647_v38, %v804_v56 }
  0xeb   : > { %1203 = vst [vmem:[%s1661_s11] sm:$0xff] %v1075_v57  ;;  %1205 = vst [vmem:[%s1661_s11 + $0x10] sm:$0xff] %v1077_v58  ;;  %v1079_v1 = vmax.f32 %v951_v59, 0.0  ;;  %v1081_v2 = vmax.f32 %v953_v60, 0.0 }
  0xec   : > { %1204 = vst [vmem:[%s1661_s11 + $0x8] sm:$0xff] %v1076_v61  ;;  %1206 = vst [vmem:[%s1661_s11 + $0x18] sm:$0xff] %v1078_v62  ;;  %v1080_v3 = vmax.f32 %v952_v63, 0.0  ;;  %v1082_v4 = vmax.f32 %v954_v0, 0.0  ;;  %v433_v5 = vpop.f32.mrb[4].mxu0  ;;  %v626_v6 = vpop.f32.mrb[4].mxu1 }
  0xed   : > { %1207 = vst [vmem:[%s1661_s11 + $0x20] sm:$0xff] %v1079_v1  ;;  %1209 = vst [vmem:[%s1661_s11 + $0x30] sm:$0xff] %v1081_v2  ;;  %v805_v7 = vmul.f32 %v1633_v29, %v433_v5  ;;  %v807_v8 = vmul.f32 %v1635_v30, %v626_v6  ;;  %v435_v9 = vpop.f32.mrb[5].mxu0  ;;  %v628_v10 = vpop.f32.mrb[5].mxu1 }
  0xee   : > { %1208 = vst [vmem:[%s1661_s11 + $0x28] sm:$0xff] %v1080_v3  ;;  %1210 = vst [vmem:[%s1661_s11 + $0x38] sm:$0xff] %v1082_v4  ;;  %v806_v11 = vmul.f32 %v1637_v31, %v435_v9  ;;  %v808_v12 = vmul.f32 %v1639_v32, %v628_v10  ;;  %v437_v13 = vpop.f32.mrb[6].mxu0  ;;  %v630_v14 = vpop.f32.mrb[6].mxu1 }
  0xef   : > { %v955_v15 = vadd.f32 %v1641_v33, %v805_v7  ;;  %v957_v16 = vadd.f32 %v1643_v34, %v807_v8  ;;  %v809_v17 = vmul.f32 %v1633_v29, %v437_v13  ;;  %v811_v18 = vmul.f32 %v1635_v30, %v630_v14  ;;  %v439_v19 = vpop.f32.mrb[7].mxu0  ;;  %v632_v20 = vpop.f32.mrb[7].mxu1 }
  0xf0   : > { %v956_v21 = vadd.f32 %v1645_v37, %v806_v11  ;;  %v958_v22 = vadd.f32 %v1647_v38, %v808_v12  ;;  %v810_v23 = vmul.f32 %v1637_v31, %v439_v19  ;;  %v812_v24 = vmul.f32 %v1639_v32, %v632_v20 }
  0xf1   : > { %v1083_v25 = vmax.f32 %v955_v15, 0.0  ;;  %v1085_v26 = vmax.f32 %v957_v16, 0.0  ;;  %v959_v27 = vadd.f32 %v1641_v33, %v809_v17  ;;  %v961_v28 = vadd.f32 %v1643_v34, %v811_v18 }
  0xf2   : > { %v1084_v35 = vmax.f32 %v956_v21, 0.0  ;;  %v1086_v36 = vmax.f32 %v958_v22, 0.0  ;;  %v960_v39 = vadd.f32 %v1645_v37, %v810_v23  ;;  %v962_v40 = vadd.f32 %v1647_v38, %v812_v24 }
  0xf3   : > { %1211 = vst [vmem:[%s1661_s11 + $0x40] sm:$0xff] %v1083_v25  ;;  %1213 = vst [vmem:[%s1661_s11 + $0x50] sm:$0xff] %v1085_v26  ;;  %v1087_v41 = vmax.f32 %v959_v27, 0.0  ;;  %v1089_v42 = vmax.f32 %v961_v28, 0.0 }
  0xf4   : > { %1212 = vst [vmem:[%s1661_s11 + $0x48] sm:$0xff] %v1084_v35  ;;  %1214 = vst [vmem:[%s1661_s11 + $0x58] sm:$0xff] %v1086_v36  ;;  %v1088_v43 = vmax.f32 %v960_v39, 0.0  ;;  %v1090_v44 = vmax.f32 %v962_v40, 0.0  ;;  %v443_v45 = vpop.f32.mrb[8].mxu0  ;;  %v636_v46 = vpop.f32.mrb[8].mxu1 }
  0xf5   : > { %1215 = vst [vmem:[%s1661_s11 + $0x60] sm:$0xff] %v1087_v41  ;;  %1217 = vst [vmem:[%s1661_s11 + $0x70] sm:$0xff] %v1089_v42  ;;  %v813_v47 = vmul.f32 %v1633_v29, %v443_v45  ;;  %v815_v48 = vmul.f32 %v1635_v30, %v636_v46  ;;  %v445_v49 = vpop.f32.mrb[9].mxu0  ;;  %v638_v50 = vpop.f32.mrb[9].mxu1 }
  0xf6   : > { %1216 = vst [vmem:[%s1661_s11 + $0x68] sm:$0xff] %v1088_v43  ;;  %1218 = vst [vmem:[%s1661_s11 + $0x78] sm:$0xff] %v1090_v44  ;;  %v814_v51 = vmul.f32 %v1637_v31, %v445_v49  ;;  %v816_v52 = vmul.f32 %v1639_v32, %v638_v50  ;;  %v447_v53 = vpop.f32.mrb[10].mxu0  ;;  %v640_v54 = vpop.f32.mrb[10].mxu1 }
  0xf7   : > { %v963_v55 = vadd.f32 %v1641_v33, %v813_v47  ;;  %v965_v56 = vadd.f32 %v1643_v34, %v815_v48  ;;  %v817_v57 = vmul.f32 %v1633_v29, %v447_v53  ;;  %v819_v58 = vmul.f32 %v1635_v30, %v640_v54  ;;  %v449_v59 = vpop.f32.mrb[11].mxu0  ;;  %v642_v60 = vpop.f32.mrb[11].mxu1 }
  0xf8   : > { %v964_v61 = vadd.f32 %v1645_v37, %v814_v51  ;;  %v966_v62 = vadd.f32 %v1647_v38, %v816_v52  ;;  %v818_v63 = vmul.f32 %v1637_v31, %v449_v59  ;;  %v820_v0 = vmul.f32 %v1639_v32, %v642_v60 }
  0xf9   : > { %v1091_v1 = vmax.f32 %v963_v55, 0.0  ;;  %v1093_v2 = vmax.f32 %v965_v56, 0.0  ;;  %v967_v3 = vadd.f32 %v1641_v33, %v817_v57  ;;  %v969_v4 = vadd.f32 %v1643_v34, %v819_v58 }
  0xfa   : > { %v1092_v5 = vmax.f32 %v964_v61, 0.0  ;;  %v1094_v6 = vmax.f32 %v966_v62, 0.0  ;;  %v968_v7 = vadd.f32 %v1645_v37, %v818_v63  ;;  %v970_v8 = vadd.f32 %v1647_v38, %v820_v0 }
  0xfb   : > { %1219 = vst [vmem:[%s1661_s11 + $0x80] sm:$0xff] %v1091_v1  ;;  %1221 = vst [vmem:[%s1661_s11 + $0x90] sm:$0xff] %v1093_v2  ;;  %v1095_v9 = vmax.f32 %v967_v3, 0.0  ;;  %v1097_v10 = vmax.f32 %v969_v4, 0.0 }
  0xfc   : > { %1220 = vst [vmem:[%s1661_s11 + $0x88] sm:$0xff] %v1092_v5  ;;  %1222 = vst [vmem:[%s1661_s11 + $0x98] sm:$0xff] %v1094_v6  ;;  %v1096_v11 = vmax.f32 %v968_v7, 0.0  ;;  %v1098_v12 = vmax.f32 %v970_v8, 0.0  ;;  %v453_v13 = vpop.f32.mrb[12].mxu0  ;;  %v646_v14 = vpop.f32.mrb[12].mxu1 }
  0xfd   : > { %1223 = vst [vmem:[%s1661_s11 + $0xa0] sm:$0xff] %v1095_v9  ;;  %1225 = vst [vmem:[%s1661_s11 + $0xb0] sm:$0xff] %v1097_v10  ;;  %v821_v15 = vmul.f32 %v1633_v29, %v453_v13  ;;  %v823_v16 = vmul.f32 %v1635_v30, %v646_v14  ;;  %v455_v17 = vpop.f32.mrb[13].mxu0  ;;  %v648_v18 = vpop.f32.mrb[13].mxu1 }
  0xfe   : > { %1224 = vst [vmem:[%s1661_s11 + $0xa8] sm:$0xff] %v1096_v11  ;;  %1226 = vst [vmem:[%s1661_s11 + $0xb8] sm:$0xff] %v1098_v12  ;;  %v822_v19 = vmul.f32 %v1637_v31, %v455_v17  ;;  %v824_v20 = vmul.f32 %v1639_v32, %v648_v18  ;;  %v457_v21 = vpop.f32.mrb[14].mxu0  ;;  %v650_v22 = vpop.f32.mrb[14].mxu1 }
  0xff   : > { %v971_v23 = vadd.f32 %v1641_v33, %v821_v15  ;;  %v973_v24 = vadd.f32 %v1643_v34, %v823_v16  ;;  %v825_v25 = vmul.f32 %v1633_v29, %v457_v21  ;;  %v827_v26 = vmul.f32 %v1635_v30, %v650_v22  ;;  %v459_v27 = vpop.f32.mrb[15].mxu0  ;;  %v652_v28 = vpop.f32.mrb[15].mxu1 }
 0x100   : > { %v972_v35 = vadd.f32 %v1645_v37, %v822_v19  ;;  %v974_v36 = vadd.f32 %v1647_v38, %v824_v20  ;;  %v826_v39 = vmul.f32 %v1637_v31, %v459_v27  ;;  %v828_v40 = vmul.f32 %v1639_v32, %v652_v28 }
 0x101   : > { %v1099_v41 = vmax.f32 %v971_v23, 0.0  ;;  %v1101_v42 = vmax.f32 %v973_v24, 0.0  ;;  %v975_v43 = vadd.f32 %v1641_v33, %v825_v25  ;;  %v977_v44 = vadd.f32 %v1643_v34, %v827_v26 }
 0x102   : > { %v1100_v45 = vmax.f32 %v972_v35, 0.0  ;;  %v1102_v46 = vmax.f32 %v974_v36, 0.0  ;;  %v976_v47 = vadd.f32 %v1645_v37, %v826_v39  ;;  %v978_v48 = vadd.f32 %v1647_v38, %v828_v40 }
 0x103   : > { %1227 = vst [vmem:[%s1661_s11 + $0xc0] sm:$0xff] %v1099_v41  ;;  %1229 = vst [vmem:[%s1661_s11 + $0xd0] sm:$0xff] %v1101_v42  ;;  %v1103_v49 = vmax.f32 %v975_v43, 0.0  ;;  %v1105_v50 = vmax.f32 %v977_v44, 0.0 }
 0x104   : > { %1228 = vst [vmem:[%s1661_s11 + $0xc8] sm:$0xff] %v1100_v45  ;;  %1230 = vst [vmem:[%s1661_s11 + $0xd8] sm:$0xff] %v1102_v46  ;;  %v1104_v51 = vmax.f32 %v976_v47, 0.0  ;;  %v1106_v52 = vmax.f32 %v978_v48, 0.0  ;;  %v463_v53 = vpop.f32.mrb[16].mxu0  ;;  %v656_v54 = vpop.f32.mrb[16].mxu1 }
 0x105   : > { %1231 = vst [vmem:[%s1661_s11 + $0xe0] sm:$0xff] %v1103_v49  ;;  %1233 = vst [vmem:[%s1661_s11 + $0xf0] sm:$0xff] %v1105_v50  ;;  %v829_v55 = vmul.f32 %v1633_v29, %v463_v53  ;;  %v831_v56 = vmul.f32 %v1635_v30, %v656_v54  ;;  %v465_v57 = vpop.f32.mrb[17].mxu0  ;;  %v658_v58 = vpop.f32.mrb[17].mxu1 }
 0x106   : > { %1232 = vst [vmem:[%s1661_s11 + $0xe8] sm:$0xff] %v1104_v51  ;;  %1234 = vst [vmem:[%s1661_s11 + $0xf8] sm:$0xff] %v1106_v52  ;;  %v830_v59 = vmul.f32 %v1637_v31, %v465_v57  ;;  %v832_v60 = vmul.f32 %v1639_v32, %v658_v58  ;;  %v467_v61 = vpop.f32.mrb[18].mxu0  ;;  %v660_v62 = vpop.f32.mrb[18].mxu1 }
 0x107   : > { %v979_v63 = vadd.f32 %v1641_v33, %v829_v55  ;;  %v981_v0 = vadd.f32 %v1643_v34, %v831_v56  ;;  %v833_v1 = vmul.f32 %v1633_v29, %v467_v61  ;;  %v835_v2 = vmul.f32 %v1635_v30, %v660_v62  ;;  %v469_v3 = vpop.f32.mrb[19].mxu0  ;;  %v662_v4 = vpop.f32.mrb[19].mxu1 }
 0x108   : > { %v980_v5 = vadd.f32 %v1645_v37, %v830_v59  ;;  %v982_v6 = vadd.f32 %v1647_v38, %v832_v60  ;;  %v834_v7 = vmul.f32 %v1637_v31, %v469_v3  ;;  %v836_v8 = vmul.f32 %v1639_v32, %v662_v4 }
 0x109   : > { %v1107_v9 = vmax.f32 %v979_v63, 0.0  ;;  %v1109_v10 = vmax.f32 %v981_v0, 0.0  ;;  %v983_v11 = vadd.f32 %v1641_v33, %v833_v1  ;;  %v985_v12 = vadd.f32 %v1643_v34, %v835_v2 }
 0x10a   : > { %v1108_v13 = vmax.f32 %v980_v5, 0.0  ;;  %v1110_v14 = vmax.f32 %v982_v6, 0.0  ;;  %v984_v15 = vadd.f32 %v1645_v37, %v834_v7  ;;  %v986_v16 = vadd.f32 %v1647_v38, %v836_v8 }
 0x10b   : > { %1235 = vst [vmem:[%s1661_s11 + $0x100] sm:$0xff] %v1107_v9  ;;  %1237 = vst [vmem:[%s1661_s11 + $0x110] sm:$0xff] %v1109_v10  ;;  %v1111_v17 = vmax.f32 %v983_v11, 0.0  ;;  %v1113_v18 = vmax.f32 %v985_v12, 0.0 }
 0x10c   : > { %1236 = vst [vmem:[%s1661_s11 + $0x108] sm:$0xff] %v1108_v13  ;;  %1238 = vst [vmem:[%s1661_s11 + $0x118] sm:$0xff] %v1110_v14  ;;  %v1112_v19 = vmax.f32 %v984_v15, 0.0  ;;  %v1114_v20 = vmax.f32 %v986_v16, 0.0  ;;  %v473_v21 = vpop.f32.mrb[20].mxu0  ;;  %v666_v22 = vpop.f32.mrb[20].mxu1 }
 0x10d   : > { %1239 = vst [vmem:[%s1661_s11 + $0x120] sm:$0xff] %v1111_v17  ;;  %1241 = vst [vmem:[%s1661_s11 + $0x130] sm:$0xff] %v1113_v18  ;;  %v837_v23 = vmul.f32 %v1633_v29, %v473_v21  ;;  %v839_v24 = vmul.f32 %v1635_v30, %v666_v22  ;;  %v475_v25 = vpop.f32.mrb[21].mxu0  ;;  %v668_v26 = vpop.f32.mrb[21].mxu1 }
 0x10e   : > { %1240 = vst [vmem:[%s1661_s11 + $0x128] sm:$0xff] %v1112_v19  ;;  %1242 = vst [vmem:[%s1661_s11 + $0x138] sm:$0xff] %v1114_v20  ;;  %v838_v27 = vmul.f32 %v1637_v31, %v475_v25  ;;  %v840_v28 = vmul.f32 %v1639_v32, %v668_v26  ;;  %v477_v35 = vpop.f32.mrb[22].mxu0  ;;  %v670_v36 = vpop.f32.mrb[22].mxu1 }
 0x10f   : > { %v987_v39 = vadd.f32 %v1641_v33, %v837_v23  ;;  %v989_v40 = vadd.f32 %v1643_v34, %v839_v24  ;;  %v841_v41 = vmul.f32 %v1633_v29, %v477_v35  ;;  %v843_v42 = vmul.f32 %v1635_v30, %v670_v36  ;;  %v479_v43 = vpop.f32.mrb[23].mxu0  ;;  %v672_v44 = vpop.f32.mrb[23].mxu1 }
 0x110   : > { %v988_v45 = vadd.f32 %v1645_v37, %v838_v27  ;;  %v990_v46 = vadd.f32 %v1647_v38, %v840_v28  ;;  %v842_v47 = vmul.f32 %v1637_v31, %v479_v43  ;;  %v844_v48 = vmul.f32 %v1639_v32, %v672_v44 }
 0x111   : > { %v1115_v49 = vmax.f32 %v987_v39, 0.0  ;;  %v1117_v50 = vmax.f32 %v989_v40, 0.0  ;;  %v991_v51 = vadd.f32 %v1641_v33, %v841_v41  ;;  %v993_v52 = vadd.f32 %v1643_v34, %v843_v42 }
 0x112   : > { %v1116_v53 = vmax.f32 %v988_v45, 0.0  ;;  %v1118_v54 = vmax.f32 %v990_v46, 0.0  ;;  %v992_v55 = vadd.f32 %v1645_v37, %v842_v47  ;;  %v994_v56 = vadd.f32 %v1647_v38, %v844_v48 }
 0x113   : > { %1243 = vst [vmem:[%s1661_s11 + $0x140] sm:$0xff] %v1115_v49  ;;  %1245 = vst [vmem:[%s1661_s11 + $0x150] sm:$0xff] %v1117_v50  ;;  %v1119_v57 = vmax.f32 %v991_v51, 0.0  ;;  %v1121_v58 = vmax.f32 %v993_v52, 0.0 }
 0x114   : > { %1244 = vst [vmem:[%s1661_s11 + $0x148] sm:$0xff] %v1116_v53  ;;  %1246 = vst [vmem:[%s1661_s11 + $0x158] sm:$0xff] %v1118_v54  ;;  %v1120_v59 = vmax.f32 %v992_v55, 0.0  ;;  %v1122_v60 = vmax.f32 %v994_v56, 0.0  ;;  %v483_v61 = vpop.f32.mrb[24].mxu0  ;;  %v676_v62 = vpop.f32.mrb[24].mxu1 }
 0x115   : > { %1247 = vst [vmem:[%s1661_s11 + $0x160] sm:$0xff] %v1119_v57  ;;  %1249 = vst [vmem:[%s1661_s11 + $0x170] sm:$0xff] %v1121_v58  ;;  %v845_v63 = vmul.f32 %v1633_v29, %v483_v61  ;;  %v847_v0 = vmul.f32 %v1635_v30, %v676_v62  ;;  %v485_v1 = vpop.f32.mrb[25].mxu0  ;;  %v678_v2 = vpop.f32.mrb[25].mxu1 }
 0x116   : > { %1248 = vst [vmem:[%s1661_s11 + $0x168] sm:$0xff] %v1120_v59  ;;  %1250 = vst [vmem:[%s1661_s11 + $0x178] sm:$0xff] %v1122_v60  ;;  %v846_v3 = vmul.f32 %v1637_v31, %v485_v1  ;;  %v848_v4 = vmul.f32 %v1639_v32, %v678_v2  ;;  %v487_v5 = vpop.f32.mrb[26].mxu0  ;;  %v680_v6 = vpop.f32.mrb[26].mxu1 }
 0x117   : > { %v995_v7 = vadd.f32 %v1641_v33, %v845_v63  ;;  %v997_v8 = vadd.f32 %v1643_v34, %v847_v0  ;;  %v849_v9 = vmul.f32 %v1633_v29, %v487_v5  ;;  %v851_v10 = vmul.f32 %v1635_v30, %v680_v6  ;;  %v489_v11 = vpop.f32.mrb[27].mxu0  ;;  %v682_v12 = vpop.f32.mrb[27].mxu1 }
 0x118   : > { %v996_v13 = vadd.f32 %v1645_v37, %v846_v3  ;;  %v998_v14 = vadd.f32 %v1647_v38, %v848_v4  ;;  %v850_v15 = vmul.f32 %v1637_v31, %v489_v11  ;;  %v852_v16 = vmul.f32 %v1639_v32, %v682_v12 }
 0x119   : > { %v1123_v17 = vmax.f32 %v995_v7, 0.0  ;;  %v1125_v18 = vmax.f32 %v997_v8, 0.0  ;;  %v999_v19 = vadd.f32 %v1641_v33, %v849_v9  ;;  %v1001_v20 = vadd.f32 %v1643_v34, %v851_v10 }
 0x11a   : > { %v1124_v21 = vmax.f32 %v996_v13, 0.0  ;;  %v1126_v22 = vmax.f32 %v998_v14, 0.0  ;;  %v1000_v23 = vadd.f32 %v1645_v37, %v850_v15  ;;  %v1002_v24 = vadd.f32 %v1647_v38, %v852_v16 }
 0x11b   : > { %1251 = vst [vmem:[%s1661_s11 + $0x180] sm:$0xff] %v1123_v17  ;;  %1253 = vst [vmem:[%s1661_s11 + $0x190] sm:$0xff] %v1125_v18  ;;  %v1127_v25 = vmax.f32 %v999_v19, 0.0  ;;  %v1129_v26 = vmax.f32 %v1001_v20, 0.0 }
 0x11c   : > { %1252 = vst [vmem:[%s1661_s11 + $0x188] sm:$0xff] %v1124_v21  ;;  %1254 = vst [vmem:[%s1661_s11 + $0x198] sm:$0xff] %v1126_v22  ;;  %v1128_v27 = vmax.f32 %v1000_v23, 0.0  ;;  %v1130_v28 = vmax.f32 %v1002_v24, 0.0  ;;  %v493_v35 = vpop.f32.mrb[28].mxu0  ;;  %v686_v36 = vpop.f32.mrb[28].mxu1 }
 0x11d   : > { %1255 = vst [vmem:[%s1661_s11 + $0x1a0] sm:$0xff] %v1127_v25  ;;  %1257 = vst [vmem:[%s1661_s11 + $0x1b0] sm:$0xff] %v1129_v26  ;;  %v853_v39 = vmul.f32 %v1633_v29, %v493_v35  ;;  %v855_v40 = vmul.f32 %v1635_v30, %v686_v36  ;;  %v495_v41 = vpop.f32.mrb[29].mxu0  ;;  %v688_v42 = vpop.f32.mrb[29].mxu1 }
 0x11e   : > { %1256 = vst [vmem:[%s1661_s11 + $0x1a8] sm:$0xff] %v1128_v27  ;;  %1258 = vst [vmem:[%s1661_s11 + $0x1b8] sm:$0xff] %v1130_v28  ;;  %v854_v43 = vmul.f32 %v1637_v31, %v495_v41  ;;  %v856_v44 = vmul.f32 %v1639_v32, %v688_v42  ;;  %v497_v45 = vpop.f32.mrb[30].mxu0  ;;  %v690_v46 = vpop.f32.mrb[30].mxu1 }
 0x11f   : > { %v1003_v47 = vadd.f32 %v1641_v33, %v853_v39  ;;  %v1005_v48 = vadd.f32 %v1643_v34, %v855_v40  ;;  %v857_v49 = vmul.f32 %v1633_v29, %v497_v45  ;;  %v859_v50 = vmul.f32 %v1635_v30, %v690_v46  ;;  %v499_v51 = vpop.f32.mrb[31].mxu0  ;;  %v692_v52 = vpop.f32.mrb[31].mxu1 }
 0x120   : > { %v1004_v53 = vadd.f32 %v1645_v37, %v854_v43  ;;  %v1006_v54 = vadd.f32 %v1647_v38, %v856_v44  ;;  %v858_v55 = vmul.f32 %v1637_v31, %v499_v51  ;;  %v860_v56 = vmul.f32 %v1639_v32, %v692_v52 }
 0x121   : > { %v1131_v57 = vmax.f32 %v1003_v47, 0.0  ;;  %v1133_v58 = vmax.f32 %v1005_v48, 0.0  ;;  %v1007_v59 = vadd.f32 %v1641_v33, %v857_v49  ;;  %v1009_v60 = vadd.f32 %v1643_v34, %v859_v50 }
 0x122   : > { %v1132_v61 = vmax.f32 %v1004_v53, 0.0  ;;  %v1134_v62 = vmax.f32 %v1006_v54, 0.0  ;;  %v1008_v63 = vadd.f32 %v1645_v37, %v858_v55  ;;  %v1010_v0 = vadd.f32 %v1647_v38, %v860_v56 }
 0x123   : > { %1259 = vst [vmem:[%s1661_s11 + $0x1c0] sm:$0xff] %v1131_v57  ;;  %1261 = vst [vmem:[%s1661_s11 + $0x1d0] sm:$0xff] %v1133_v58  ;;  %v1135_v1 = vmax.f32 %v1007_v59, 0.0  ;;  %v1137_v2 = vmax.f32 %v1009_v60, 0.0 }
 0x124   : > { %1260 = vst [vmem:[%s1661_s11 + $0x1c8] sm:$0xff] %v1132_v61  ;;  %1262 = vst [vmem:[%s1661_s11 + $0x1d8] sm:$0xff] %v1134_v62  ;;  %v1136_v3 = vmax.f32 %v1008_v63, 0.0  ;;  %v1138_v4 = vmax.f32 %v1010_v0, 0.0  ;;  %v503_v5 = vpop.f32.mrb[32].mxu0  ;;  %v696_v6 = vpop.f32.mrb[32].mxu1 }
 0x125   : > { %1263 = vst [vmem:[%s1661_s11 + $0x1e0] sm:$0xff] %v1135_v1  ;;  %1265 = vst [vmem:[%s1661_s11 + $0x1f0] sm:$0xff] %v1137_v2  ;;  %v861_v7 = vmul.f32 %v1633_v29, %v503_v5  ;;  %v863_v8 = vmul.f32 %v1635_v30, %v696_v6  ;;  %v505_v9 = vpop.f32.mrb[33].mxu0  ;;  %v698_v10 = vpop.f32.mrb[33].mxu1 }
 0x126   : > { %1264 = vst [vmem:[%s1661_s11 + $0x1e8] sm:$0xff] %v1136_v3  ;;  %1266 = vst [vmem:[%s1661_s11 + $0x1f8] sm:$0xff] %v1138_v4  ;;  %v862_v11 = vmul.f32 %v1637_v31, %v505_v9  ;;  %v864_v12 = vmul.f32 %v1639_v32, %v698_v10  ;;  %v507_v13 = vpop.f32.mrb[34].mxu0  ;;  %v700_v14 = vpop.f32.mrb[34].mxu1 }
 0x127   : > { %v1011_v15 = vadd.f32 %v1641_v33, %v861_v7  ;;  %v1013_v16 = vadd.f32 %v1643_v34, %v863_v8  ;;  %v865_v17 = vmul.f32 %v1633_v29, %v507_v13  ;;  %v867_v18 = vmul.f32 %v1635_v30, %v700_v14  ;;  %v509_v19 = vpop.f32.mrb[35].mxu0  ;;  %v702_v20 = vpop.f32.mrb[35].mxu1 }
 0x128   : > { %v1012_v21 = vadd.f32 %v1645_v37, %v862_v11  ;;  %v1014_v22 = vadd.f32 %v1647_v38, %v864_v12  ;;  %v866_v23 = vmul.f32 %v1637_v31, %v509_v19  ;;  %v868_v24 = vmul.f32 %v1639_v32, %v702_v20 }
 0x129   : > { %v1139_v25 = vmax.f32 %v1011_v15, 0.0  ;;  %v1141_v26 = vmax.f32 %v1013_v16, 0.0  ;;  %v1015_v27 = vadd.f32 %v1641_v33, %v865_v17  ;;  %v1017_v28 = vadd.f32 %v1643_v34, %v867_v18 }
 0x12a   : > { %v1140_v35 = vmax.f32 %v1012_v21, 0.0  ;;  %v1142_v36 = vmax.f32 %v1014_v22, 0.0  ;;  %v1016_v39 = vadd.f32 %v1645_v37, %v866_v23  ;;  %v1018_v40 = vadd.f32 %v1647_v38, %v868_v24 }
 0x12b   : > { %1267 = vst [vmem:[%s1661_s11 + $0x200] sm:$0xff] %v1139_v25  ;;  %1269 = vst [vmem:[%s1661_s11 + $0x210] sm:$0xff] %v1141_v26  ;;  %v1143_v41 = vmax.f32 %v1015_v27, 0.0  ;;  %v1145_v42 = vmax.f32 %v1017_v28, 0.0 }
 0x12c   : > { %1268 = vst [vmem:[%s1661_s11 + $0x208] sm:$0xff] %v1140_v35  ;;  %1270 = vst [vmem:[%s1661_s11 + $0x218] sm:$0xff] %v1142_v36  ;;  %v1144_v43 = vmax.f32 %v1016_v39, 0.0  ;;  %v1146_v44 = vmax.f32 %v1018_v40, 0.0  ;;  %v513_v45 = vpop.f32.mrb[36].mxu0  ;;  %v706_v46 = vpop.f32.mrb[36].mxu1 }
 0x12d   : > { %1271 = vst [vmem:[%s1661_s11 + $0x220] sm:$0xff] %v1143_v41  ;;  %1273 = vst [vmem:[%s1661_s11 + $0x230] sm:$0xff] %v1145_v42  ;;  %v869_v47 = vmul.f32 %v1633_v29, %v513_v45  ;;  %v871_v48 = vmul.f32 %v1635_v30, %v706_v46  ;;  %v515_v49 = vpop.f32.mrb[37].mxu0  ;;  %v708_v50 = vpop.f32.mrb[37].mxu1 }
 0x12e   : > { %1272 = vst [vmem:[%s1661_s11 + $0x228] sm:$0xff] %v1144_v43  ;;  %1274 = vst [vmem:[%s1661_s11 + $0x238] sm:$0xff] %v1146_v44  ;;  %v870_v51 = vmul.f32 %v1637_v31, %v515_v49  ;;  %v872_v52 = vmul.f32 %v1639_v32, %v708_v50  ;;  %v517_v53 = vpop.f32.mrb[38].mxu0  ;;  %v710_v54 = vpop.f32.mrb[38].mxu1 }
 0x12f   : > { %v1019_v55 = vadd.f32 %v1641_v33, %v869_v47  ;;  %v1021_v56 = vadd.f32 %v1643_v34, %v871_v48  ;;  %v873_v57 = vmul.f32 %v1633_v29, %v517_v53  ;;  %v875_v58 = vmul.f32 %v1635_v30, %v710_v54  ;;  %v519_v59 = vpop.f32.mrb[39].mxu0  ;;  %v712_v60 = vpop.f32.mrb[39].mxu1 }
 0x130   : > { %v1020_v61 = vadd.f32 %v1645_v37, %v870_v51  ;;  %v1022_v62 = vadd.f32 %v1647_v38, %v872_v52  ;;  %v874_v63 = vmul.f32 %v1637_v31, %v519_v59  ;;  %v876_v0 = vmul.f32 %v1639_v32, %v712_v60 }
 0x131   : > { %v1147_v1 = vmax.f32 %v1019_v55, 0.0  ;;  %v1149_v2 = vmax.f32 %v1021_v56, 0.0  ;;  %v1023_v3 = vadd.f32 %v1641_v33, %v873_v57  ;;  %v1025_v4 = vadd.f32 %v1643_v34, %v875_v58 }
 0x132   : > { %v1148_v5 = vmax.f32 %v1020_v61, 0.0  ;;  %v1150_v6 = vmax.f32 %v1022_v62, 0.0  ;;  %v1024_v7 = vadd.f32 %v1645_v37, %v874_v63  ;;  %v1026_v8 = vadd.f32 %v1647_v38, %v876_v0 }
 0x133   : > { %1275 = vst [vmem:[%s1661_s11 + $0x240] sm:$0xff] %v1147_v1  ;;  %1277 = vst [vmem:[%s1661_s11 + $0x250] sm:$0xff] %v1149_v2  ;;  %v1151_v9 = vmax.f32 %v1023_v3, 0.0  ;;  %v1153_v10 = vmax.f32 %v1025_v4, 0.0 }
 0x134   : > { %1276 = vst [vmem:[%s1661_s11 + $0x248] sm:$0xff] %v1148_v5  ;;  %1278 = vst [vmem:[%s1661_s11 + $0x258] sm:$0xff] %v1150_v6  ;;  %v1152_v11 = vmax.f32 %v1024_v7, 0.0  ;;  %v1154_v12 = vmax.f32 %v1026_v8, 0.0  ;;  %v523_v13 = vpop.f32.mrb[40].mxu0  ;;  %v716_v14 = vpop.f32.mrb[40].mxu1 }
 0x135   : > { %1279 = vst [vmem:[%s1661_s11 + $0x260] sm:$0xff] %v1151_v9  ;;  %1281 = vst [vmem:[%s1661_s11 + $0x270] sm:$0xff] %v1153_v10  ;;  %v877_v15 = vmul.f32 %v1633_v29, %v523_v13  ;;  %v879_v16 = vmul.f32 %v1635_v30, %v716_v14  ;;  %v525_v17 = vpop.f32.mrb[41].mxu0  ;;  %v718_v18 = vpop.f32.mrb[41].mxu1 }
 0x136   : > { %1280 = vst [vmem:[%s1661_s11 + $0x268] sm:$0xff] %v1152_v11  ;;  %1282 = vst [vmem:[%s1661_s11 + $0x278] sm:$0xff] %v1154_v12  ;;  %v878_v19 = vmul.f32 %v1637_v31, %v525_v17  ;;  %v880_v20 = vmul.f32 %v1639_v32, %v718_v18  ;;  %v527_v21 = vpop.f32.mrb[42].mxu0  ;;  %v720_v22 = vpop.f32.mrb[42].mxu1 }
 0x137   : > { %v1027_v23 = vadd.f32 %v1641_v33, %v877_v15  ;;  %v1029_v24 = vadd.f32 %v1643_v34, %v879_v16  ;;  %v881_v25 = vmul.f32 %v1633_v29, %v527_v21  ;;  %v883_v26 = vmul.f32 %v1635_v30, %v720_v22  ;;  %v529_v27 = vpop.f32.mrb[43].mxu0  ;;  %v722_v28 = vpop.f32.mrb[43].mxu1 }
 0x138   : > { %v1028_v35 = vadd.f32 %v1645_v37, %v878_v19  ;;  %v1030_v36 = vadd.f32 %v1647_v38, %v880_v20  ;;  %v882_v39 = vmul.f32 %v1637_v31, %v529_v27  ;;  %v884_v40 = vmul.f32 %v1639_v32, %v722_v28 }
 0x139   : > { %v1155_v41 = vmax.f32 %v1027_v23, 0.0  ;;  %v1157_v42 = vmax.f32 %v1029_v24, 0.0  ;;  %v1031_v43 = vadd.f32 %v1641_v33, %v881_v25  ;;  %v1033_v44 = vadd.f32 %v1643_v34, %v883_v26 }
 0x13a   : > { %v1156_v45 = vmax.f32 %v1028_v35, 0.0  ;;  %v1158_v46 = vmax.f32 %v1030_v36, 0.0  ;;  %v1032_v47 = vadd.f32 %v1645_v37, %v882_v39  ;;  %v1034_v48 = vadd.f32 %v1647_v38, %v884_v40 }
 0x13b   : > { %1283 = vst [vmem:[%s1661_s11 + $0x280] sm:$0xff] %v1155_v41  ;;  %1285 = vst [vmem:[%s1661_s11 + $0x290] sm:$0xff] %v1157_v42  ;;  %v1159_v49 = vmax.f32 %v1031_v43, 0.0  ;;  %v1161_v50 = vmax.f32 %v1033_v44, 0.0 }
 0x13c   : > { %1284 = vst [vmem:[%s1661_s11 + $0x288] sm:$0xff] %v1156_v45  ;;  %1286 = vst [vmem:[%s1661_s11 + $0x298] sm:$0xff] %v1158_v46  ;;  %v1160_v51 = vmax.f32 %v1032_v47, 0.0  ;;  %v1162_v52 = vmax.f32 %v1034_v48, 0.0  ;;  %v533_v53 = vpop.f32.mrb[44].mxu0  ;;  %v726_v54 = vpop.f32.mrb[44].mxu1 }
 0x13d   : > { %1287 = vst [vmem:[%s1661_s11 + $0x2a0] sm:$0xff] %v1159_v49  ;;  %1289 = vst [vmem:[%s1661_s11 + $0x2b0] sm:$0xff] %v1161_v50  ;;  %v885_v55 = vmul.f32 %v1633_v29, %v533_v53  ;;  %v887_v56 = vmul.f32 %v1635_v30, %v726_v54  ;;  %v535_v57 = vpop.f32.mrb[45].mxu0  ;;  %v728_v58 = vpop.f32.mrb[45].mxu1 }
 0x13e   : > { %1288 = vst [vmem:[%s1661_s11 + $0x2a8] sm:$0xff] %v1160_v51  ;;  %1290 = vst [vmem:[%s1661_s11 + $0x2b8] sm:$0xff] %v1162_v52  ;;  %v886_v59 = vmul.f32 %v1637_v31, %v535_v57  ;;  %v888_v60 = vmul.f32 %v1639_v32, %v728_v58  ;;  %v537_v61 = vpop.f32.mrb[46].mxu0  ;;  %v730_v62 = vpop.f32.mrb[46].mxu1 }
 0x13f   : > { %v1035_v63 = vadd.f32 %v1641_v33, %v885_v55  ;;  %v1037_v0 = vadd.f32 %v1643_v34, %v887_v56  ;;  %v889_v1 = vmul.f32 %v1633_v29, %v537_v61  ;;  %v891_v2 = vmul.f32 %v1635_v30, %v730_v62  ;;  %v539_v3 = vpop.f32.mrb[47].mxu0  ;;  %v732_v4 = vpop.f32.mrb[47].mxu1 }
 0x140   : > { %v1036_v5 = vadd.f32 %v1645_v37, %v886_v59  ;;  %v1038_v6 = vadd.f32 %v1647_v38, %v888_v60  ;;  %v890_v7 = vmul.f32 %v1637_v31, %v539_v3  ;;  %v892_v8 = vmul.f32 %v1639_v32, %v732_v4 }
 0x141   : > { %v1163_v9 = vmax.f32 %v1035_v63, 0.0  ;;  %v1165_v10 = vmax.f32 %v1037_v0, 0.0  ;;  %v1039_v11 = vadd.f32 %v1641_v33, %v889_v1  ;;  %v1041_v12 = vadd.f32 %v1643_v34, %v891_v2 }
 0x142   : > { %v1164_v13 = vmax.f32 %v1036_v5, 0.0  ;;  %v1166_v14 = vmax.f32 %v1038_v6, 0.0  ;;  %v1040_v15 = vadd.f32 %v1645_v37, %v890_v7  ;;  %v1042_v16 = vadd.f32 %v1647_v38, %v892_v8 }
 0x143   : > { %1291 = vst [vmem:[%s1661_s11 + $0x2c0] sm:$0xff] %v1163_v9  ;;  %1293 = vst [vmem:[%s1661_s11 + $0x2d0] sm:$0xff] %v1165_v10  ;;  %v1167_v17 = vmax.f32 %v1039_v11, 0.0  ;;  %v1169_v18 = vmax.f32 %v1041_v12, 0.0 }
 0x144   : > { %1292 = vst [vmem:[%s1661_s11 + $0x2c8] sm:$0xff] %v1164_v13  ;;  %1294 = vst [vmem:[%s1661_s11 + $0x2d8] sm:$0xff] %v1166_v14  ;;  %v1168_v19 = vmax.f32 %v1040_v15, 0.0  ;;  %v1170_v20 = vmax.f32 %v1042_v16, 0.0  ;;  %v543_v21 = vpop.f32.mrb[48].mxu0  ;;  %v736_v22 = vpop.f32.mrb[48].mxu1 }
 0x145   : > { %1295 = vst [vmem:[%s1661_s11 + $0x2e0] sm:$0xff] %v1167_v17  ;;  %1297 = vst [vmem:[%s1661_s11 + $0x2f0] sm:$0xff] %v1169_v18  ;;  %v893_v23 = vmul.f32 %v1633_v29, %v543_v21  ;;  %v895_v24 = vmul.f32 %v1635_v30, %v736_v22  ;;  %v545_v25 = vpop.f32.mrb[49].mxu0  ;;  %v738_v26 = vpop.f32.mrb[49].mxu1 }
 0x146   : > { %1296 = vst [vmem:[%s1661_s11 + $0x2e8] sm:$0xff] %v1168_v19  ;;  %1298 = vst [vmem:[%s1661_s11 + $0x2f8] sm:$0xff] %v1170_v20  ;;  %v894_v27 = vmul.f32 %v1637_v31, %v545_v25  ;;  %v896_v28 = vmul.f32 %v1639_v32, %v738_v26  ;;  %v547_v35 = vpop.f32.mrb[50].mxu0  ;;  %v740_v36 = vpop.f32.mrb[50].mxu1 }
 0x147   : > { %v1043_v39 = vadd.f32 %v1641_v33, %v893_v23  ;;  %v1045_v40 = vadd.f32 %v1643_v34, %v895_v24  ;;  %v897_v41 = vmul.f32 %v1633_v29, %v547_v35  ;;  %v899_v42 = vmul.f32 %v1635_v30, %v740_v36  ;;  %v549_v43 = vpop.f32.mrb[51].mxu0  ;;  %v742_v44 = vpop.f32.mrb[51].mxu1 }
 0x148   : > { %v1044_v45 = vadd.f32 %v1645_v37, %v894_v27  ;;  %v1046_v46 = vadd.f32 %v1647_v38, %v896_v28  ;;  %v898_v47 = vmul.f32 %v1637_v31, %v549_v43  ;;  %v900_v48 = vmul.f32 %v1639_v32, %v742_v44 }
 0x149   : > { %v1171_v49 = vmax.f32 %v1043_v39, 0.0  ;;  %v1173_v50 = vmax.f32 %v1045_v40, 0.0  ;;  %v1047_v51 = vadd.f32 %v1641_v33, %v897_v41  ;;  %v1049_v52 = vadd.f32 %v1643_v34, %v899_v42 }
 0x14a   : > { %v1172_v53 = vmax.f32 %v1044_v45, 0.0  ;;  %v1174_v54 = vmax.f32 %v1046_v46, 0.0  ;;  %v1048_v55 = vadd.f32 %v1645_v37, %v898_v47  ;;  %v1050_v56 = vadd.f32 %v1647_v38, %v900_v48 }
 0x14b   : > { %1299 = vst [vmem:[%s1661_s11 + $0x300] sm:$0xff] %v1171_v49  ;;  %1301 = vst [vmem:[%s1661_s11 + $0x310] sm:$0xff] %v1173_v50  ;;  %v1175_v57 = vmax.f32 %v1047_v51, 0.0  ;;  %v1177_v58 = vmax.f32 %v1049_v52, 0.0 }
 0x14c   : > { %1300 = vst [vmem:[%s1661_s11 + $0x308] sm:$0xff] %v1172_v53  ;;  %1302 = vst [vmem:[%s1661_s11 + $0x318] sm:$0xff] %v1174_v54  ;;  %v1176_v59 = vmax.f32 %v1048_v55, 0.0  ;;  %v1178_v60 = vmax.f32 %v1050_v56, 0.0  ;;  %v553_v61 = vpop.f32.mrb[52].mxu0  ;;  %v746_v62 = vpop.f32.mrb[52].mxu1 }
 0x14d   : > { %1303 = vst [vmem:[%s1661_s11 + $0x320] sm:$0xff] %v1175_v57  ;;  %1305 = vst [vmem:[%s1661_s11 + $0x330] sm:$0xff] %v1177_v58  ;;  %v901_v63 = vmul.f32 %v1633_v29, %v553_v61  ;;  %v903_v0 = vmul.f32 %v1635_v30, %v746_v62  ;;  %v555_v1 = vpop.f32.mrb[53].mxu0  ;;  %v748_v2 = vpop.f32.mrb[53].mxu1 }
 0x14e   : > { %1304 = vst [vmem:[%s1661_s11 + $0x328] sm:$0xff] %v1176_v59  ;;  %1306 = vst [vmem:[%s1661_s11 + $0x338] sm:$0xff] %v1178_v60  ;;  %v902_v3 = vmul.f32 %v1637_v31, %v555_v1  ;;  %v904_v4 = vmul.f32 %v1639_v32, %v748_v2  ;;  %v557_v5 = vpop.f32.mrb[54].mxu0  ;;  %v750_v6 = vpop.f32.mrb[54].mxu1 }
 0x14f   : > { %v1051_v7 = vadd.f32 %v1641_v33, %v901_v63  ;;  %v1053_v8 = vadd.f32 %v1643_v34, %v903_v0  ;;  %v905_v9 = vmul.f32 %v1633_v29, %v557_v5  ;;  %v907_v10 = vmul.f32 %v1635_v30, %v750_v6  ;;  %v559_v11 = vpop.f32.mrb[55].mxu0  ;;  %v752_v12 = vpop.f32.mrb[55].mxu1 }
 0x150   : > { %v1052_v13 = vadd.f32 %v1645_v37, %v902_v3  ;;  %v1054_v14 = vadd.f32 %v1647_v38, %v904_v4  ;;  %v906_v15 = vmul.f32 %v1637_v31, %v559_v11  ;;  %v908_v16 = vmul.f32 %v1639_v32, %v752_v12 }
 0x151   : > { %v1179_v17 = vmax.f32 %v1051_v7, 0.0  ;;  %v1181_v18 = vmax.f32 %v1053_v8, 0.0  ;;  %v1055_v19 = vadd.f32 %v1641_v33, %v905_v9  ;;  %v1057_v20 = vadd.f32 %v1643_v34, %v907_v10 }
 0x152   : > { %v1180_v21 = vmax.f32 %v1052_v13, 0.0  ;;  %v1182_v22 = vmax.f32 %v1054_v14, 0.0  ;;  %v1056_v23 = vadd.f32 %v1645_v37, %v906_v15  ;;  %v1058_v24 = vadd.f32 %v1647_v38, %v908_v16 }
 0x153   : > { %1307 = vst [vmem:[%s1661_s11 + $0x340] sm:$0xff] %v1179_v17  ;;  %1309 = vst [vmem:[%s1661_s11 + $0x350] sm:$0xff] %v1181_v18  ;;  %v1183_v25 = vmax.f32 %v1055_v19, 0.0  ;;  %v1185_v26 = vmax.f32 %v1057_v20, 0.0 }
 0x154   : > { %1308 = vst [vmem:[%s1661_s11 + $0x348] sm:$0xff] %v1180_v21  ;;  %1310 = vst [vmem:[%s1661_s11 + $0x358] sm:$0xff] %v1182_v22  ;;  %v1184_v27 = vmax.f32 %v1056_v23, 0.0  ;;  %v1186_v28 = vmax.f32 %v1058_v24, 0.0  ;;  %v563_v35 = vpop.f32.mrb[56].mxu0  ;;  %v756_v36 = vpop.f32.mrb[56].mxu1 }
 0x155   : > { %1311 = vst [vmem:[%s1661_s11 + $0x360] sm:$0xff] %v1183_v25  ;;  %1313 = vst [vmem:[%s1661_s11 + $0x370] sm:$0xff] %v1185_v26  ;;  %v909_v39 = vmul.f32 %v1633_v29, %v563_v35  ;;  %v911_v40 = vmul.f32 %v1635_v30, %v756_v36  ;;  %v565_v41 = vpop.f32.mrb[57].mxu0  ;;  %v758_v42 = vpop.f32.mrb[57].mxu1 }
 0x156   : > { %1312 = vst [vmem:[%s1661_s11 + $0x368] sm:$0xff] %v1184_v27  ;;  %1314 = vst [vmem:[%s1661_s11 + $0x378] sm:$0xff] %v1186_v28  ;;  %v910_v43 = vmul.f32 %v1637_v31, %v565_v41  ;;  %v912_v44 = vmul.f32 %v1639_v32, %v758_v42  ;;  %v567_v45 = vpop.f32.mrb[58].mxu0  ;;  %v760_v46 = vpop.f32.mrb[58].mxu1 }
 0x157   : > { %v1059_v47 = vadd.f32 %v1641_v33, %v909_v39  ;;  %v1061_v48 = vadd.f32 %v1643_v34, %v911_v40  ;;  %v913_v49 = vmul.f32 %v1633_v29, %v567_v45  ;;  %v915_v50 = vmul.f32 %v1635_v30, %v760_v46  ;;  %v569_v51 = vpop.f32.mrb[59].mxu0  ;;  %v762_v52 = vpop.f32.mrb[59].mxu1 }
 0x158   : > { %v1060_v53 = vadd.f32 %v1645_v37, %v910_v43  ;;  %v1062_v54 = vadd.f32 %v1647_v38, %v912_v44  ;;  %v914_v55 = vmul.f32 %v1637_v31, %v569_v51  ;;  %v916_v56 = vmul.f32 %v1639_v32, %v762_v52 }
 0x159   : > { %v1187_v57 = vmax.f32 %v1059_v47, 0.0  ;;  %v1189_v58 = vmax.f32 %v1061_v48, 0.0  ;;  %v1063_v59 = vadd.f32 %v1641_v33, %v913_v49  ;;  %v1065_v60 = vadd.f32 %v1643_v34, %v915_v50 }
 0x15a   : > { %v1188_v61 = vmax.f32 %v1060_v53, 0.0  ;;  %v1190_v62 = vmax.f32 %v1062_v54, 0.0  ;;  %v1064_v63 = vadd.f32 %v1645_v37, %v914_v55  ;;  %v1066_v0 = vadd.f32 %v1647_v38, %v916_v56 }
 0x15b   : > { %1315 = vst [vmem:[%s1661_s11 + $0x380] sm:$0xff] %v1187_v57  ;;  %1317 = vst [vmem:[%s1661_s11 + $0x390] sm:$0xff] %v1189_v58  ;;  %v1191_v1 = vmax.f32 %v1063_v59, 0.0  ;;  %v1193_v2 = vmax.f32 %v1065_v60, 0.0 }
 0x15c   : > { %1316 = vst [vmem:[%s1661_s11 + $0x388] sm:$0xff] %v1188_v61  ;;  %1318 = vst [vmem:[%s1661_s11 + $0x398] sm:$0xff] %v1190_v62  ;;  %v1192_v3 = vmax.f32 %v1064_v63, 0.0  ;;  %v1194_v4 = vmax.f32 %v1066_v0, 0.0  ;;  %v573_v5 = vpop.f32.mrb[60].mxu0  ;;  %v766_v6 = vpop.f32.mrb[60].mxu1 }
 0x15d   : > { %1319 = vst [vmem:[%s1661_s11 + $0x3a0] sm:$0xff] %v1191_v1  ;;  %1321 = vst [vmem:[%s1661_s11 + $0x3b0] sm:$0xff] %v1193_v2  ;;  %v917_v7 = vmul.f32 %v1633_v29, %v573_v5  ;;  %v919_v8 = vmul.f32 %v1635_v30, %v766_v6  ;;  %v575_v9 = vpop.f32.mrb[61].mxu0  ;;  %v768_v10 = vpop.f32.mrb[61].mxu1 }
 0x15e   : > { %1320 = vst [vmem:[%s1661_s11 + $0x3a8] sm:$0xff] %v1192_v3  ;;  %1322 = vst [vmem:[%s1661_s11 + $0x3b8] sm:$0xff] %v1194_v4  ;;  %v918_v11 = vmul.f32 %v1637_v31, %v575_v9  ;;  %v920_v12 = vmul.f32 %v1639_v32, %v768_v10  ;;  %v577_v13 = vpop.f32.mrb[62].mxu0  ;;  %v770_v14 = vpop.f32.mrb[62].mxu1 }
 0x15f   : > { %v1067_v15 = vadd.f32 %v1641_v33, %v917_v7  ;;  %v1069_v16 = vadd.f32 %v1643_v34, %v919_v8  ;;  %v921_v17 = vmul.f32 %v1633_v29, %v577_v13  ;;  %v923_v18 = vmul.f32 %v1635_v30, %v770_v14  ;;  %v579_v19 = vpop.f32.mrb[63].mxu0  ;;  %v772_v20 = vpop.f32.mrb[63].mxu1 }
 0x160   : > { %v1068_v21 = vadd.f32 %v1645_v37, %v918_v11  ;;  %v1070_v22 = vadd.f32 %v1647_v38, %v920_v12  ;;  %v922_v23 = vmul.f32 %v1637_v31, %v579_v19  ;;  %v924_v24 = vmul.f32 %v1639_v32, %v772_v20 }
 0x161   : > { %v1195_v25 = vmax.f32 %v1067_v15, 0.0  ;;  %v1197_v26 = vmax.f32 %v1069_v16, 0.0  ;;  %v1071_v29 = vadd.f32 %v1641_v33, %v921_v17  ;;  %v1073_v30 = vadd.f32 %v1643_v34, %v923_v18 }
 0x162   : > { %v1196_v27 = vmax.f32 %v1068_v21, 0.0  ;;  %v1198_v28 = vmax.f32 %v1070_v22, 0.0  ;;  %v1072_v35 = vadd.f32 %v1645_v37, %v922_v23  ;;  %v1074_v36 = vadd.f32 %v1647_v38, %v924_v24 }
 0x163   : > { %1323 = vst [vmem:[%s1661_s11 + $0x3c0] sm:$0xff] %v1195_v25  ;;  %1325 = vst [vmem:[%s1661_s11 + $0x3d0] sm:$0xff] %v1197_v26  ;;  %v1199_v31 = vmax.f32 %v1071_v29, 0.0  ;;  %v1201_v32 = vmax.f32 %v1073_v30, 0.0 }
 0x164   : > { %1324 = vst [vmem:[%s1661_s11 + $0x3c8] sm:$0xff] %v1196_v27  ;;  %1326 = vst [vmem:[%s1661_s11 + $0x3d8] sm:$0xff] %v1198_v28  ;;  %v1200_v39 = vmax.f32 %v1072_v35, 0.0  ;;  %v1202_v40 = vmax.f32 %v1074_v36, 0.0 }
 0x165   : > { %1327 = vst [vmem:[%s1661_s11 + $0x3e0] sm:$0xff] %v1199_v31  ;;  %1329 = vst [vmem:[%s1661_s11 + $0x3f0] sm:$0xff] %v1201_v32 }
 0x166   : > { %1328 = vst [vmem:[%s1661_s11 + $0x3e8] sm:$0xff] %v1200_v39  ;;  %1330 = vst [vmem:[%s1661_s11 + $0x3f8] sm:$0xff] %v1202_v40 }
 0x167 PF: > { %s14_s15 = sadd.s32 1, %s1491_s15  }
 0x168   : > { %p11_p4 = scmp.ge.s32.totalorder %s14_s15, 4  }
 0x16a   :  { %13 = sbr.rel (!%p11_p4) target bundleno = 1 (0x1), region = 66 }

</bundles_post_ra>
